<compile_context>
chip_gen: v7x
topology: tpu7x:2x2x1
jax: 0.10.0
libtpu: 0.0.40
codegen_flags: <defaults>
</compile_context>

<pallas_src>
import jax
import jax.numpy as jnp
from jax.experimental import pallas as pl
from jax.experimental.pallas import tpu as pltpu

OUT_DIM = 7   # logical output width of Linear3
OUT_PAD = 8   # padded to one sublane tile


def mlp_kernel(x_ref, w1_ref, b1_ref, w2_ref, b2_ref, w3t_ref, b3t_ref, o_ref):
    """Fused Linear1 -> Linear2 -> Linear3; final layer computed transposed.

    Weight refs are f32 (exact path) or bf16 (perf path, pre-cast in the
    wrapper); accumulation and bias adds are always f32.
    """
    wd = w1_ref.dtype
    h1 = jnp.dot(x_ref[...].astype(wd), w1_ref[...],
                 preferred_element_type=jnp.float32) + b1_ref[...]
    h2 = jnp.dot(h1.astype(wd), w2_ref[...],
                 preferred_element_type=jnp.float32) + b2_ref[...]
    # (OUT_PAD, hd2) . (tb, hd2)^T -> (OUT_PAD, tb): batch lands on the lane
    # axis, so the store below is lane-dense (no vst.msk).
    h3t = jax.lax.dot_general(
        w3t_ref[...], h2.astype(wd),
        dimension_numbers=(((1,), (1,)), ((), ())),
        preferred_element_type=jnp.float32) + b3t_ref[...]
    o_ref[...] = h3t.astype(o_ref.dtype)


def folded_kernel(x_ref, wct_ref, bct_ref, o_ref):
    """Single-matmul form: y^T = Wc^T x^T + bc^T (layers folded in wrapper)."""
    yt = jax.lax.dot_general(
        wct_ref[...], x_ref[...].astype(wct_ref.dtype),
        dimension_numbers=(((1,), (1,)), ((), ())),
        preferred_element_type=jnp.float32) + bct_ref[...]
    o_ref[...] = yt.astype(o_ref.dtype)


def _choose_tile(batch, tb_max):
    # Small batches: a single full-extent block (always a legal block shape).
    if batch <= 512:
        return batch
    # Large batches: 128-multiple tile, capped at tb_max, targeting >= 4 grid
    # steps so v7x gets >= 2 steps per TensorCore (pipelining + megacore).
    tb = (batch // 4) // 128 * 128
    return max(128, min(tb_max, tb))


def basic_model_forward(x, params, *, tb_max=2048, use_bf16_mxu=False,
                        fold_layers=False):
    """y = Linear3(Linear2(Linear1(x))); returns (batch, 7) float32."""
    w1, b1, w2, b2, w3t, b3t = params
    x = x.astype(jnp.float32)
    batch, in_dim = x.shape
    hd1 = w1.shape[1]
    hd2 = w2.shape[1]
    n_pad = w3t.shape[0]          # 8

    tb = _choose_tile(batch, tb_max)
    grid = (pl.cdiv(batch, tb),)  # no jnp.pad: partial boundary block is masked

    wdtype = jnp.bfloat16 if use_bf16_mxu else jnp.float32
    w_bytes = 2 if use_bf16_mxu else 4

    common = dict(
        out_shape=jax.ShapeDtypeStruct((n_pad, batch), jnp.float32),
        grid=grid,
        out_specs=pl.BlockSpec((n_pad, tb), lambda i: (0, i)),
        compiler_params=pltpu.CompilerParams(
            dimension_semantics=("parallel",)),
    )
    x_spec = pl.BlockSpec((tb, in_dim), lambda i: (i, 0))

    if fold_layers:
        # Algebraic fold (valid because there are no activations).
        w3 = w3t.T.astype(jnp.float32)                 # (hd2, n_pad)
        b3 = b3t.T.astype(jnp.float32)                 # (1, n_pad)
        wc = (w1 @ w2) @ w3                            # (in_dim, n_pad)
        bc = (b1 @ w2 + b2) @ w3 + b3                  # (1, n_pad)
        wct = wc.T.astype(wdtype)                      # (n_pad, in_dim)
        bct = bc.T                                     # (n_pad, 1)
        flops = 2 * batch * in_dim * n_pad
        bytes_accessed = (4 * (batch * in_dim + batch * n_pad + n_pad)
                          + w_bytes * in_dim * n_pad)
        out = pl.pallas_call(
            folded_kernel,
            in_specs=[
                x_spec,
                pl.BlockSpec((n_pad, in_dim), lambda i: (0, 0)),
                pl.BlockSpec((n_pad, 1),      lambda i: (0, 0)),
            ],
            cost_estimate=pl.CostEstimate(
                flops=flops, transcendentals=0, bytes_accessed=bytes_accessed),
            **common,
        )(x, wct, bct)
    else:
        if use_bf16_mxu:
            w1c, w2c, w3tc = (w.astype(wdtype) for w in (w1, w2, w3t))
        else:
            w1c, w2c, w3tc = w1, w2, w3t
        flops = 2 * batch * (in_dim * hd1 + hd1 * hd2 + hd2 * n_pad)
        bytes_accessed = (
            4 * (batch * in_dim + batch * n_pad + hd1 + hd2 + n_pad)
            + w_bytes * (in_dim * hd1 + hd1 * hd2 + hd2 * n_pad))
        out = pl.pallas_call(
            mlp_kernel,
            in_specs=[
                x_spec,
                pl.BlockSpec((in_dim, hd1), lambda i: (0, 0)),   # w1 (resident)
                pl.BlockSpec((1, hd1),      lambda i: (0, 0)),   # b1
                pl.BlockSpec((hd1, hd2),    lambda i: (0, 0)),   # w2
                pl.BlockSpec((1, hd2),      lambda i: (0, 0)),   # b2
                pl.BlockSpec((n_pad, hd2),  lambda i: (0, 0)),   # w3^T (8 rows)
                pl.BlockSpec((n_pad, 1),    lambda i: (0, 0)),   # b3^T
            ],
            cost_estimate=pl.CostEstimate(
                flops=flops, transcendentals=0, bytes_accessed=bytes_accessed),
            **common,
        )(x, w1c, b1, w2c, b2, w3tc, b3t)

    # (8, batch) lane-dense result -> (batch, 7); tiny XLA slice + transpose.
    return out[:OUT_DIM, :].T


def init_params(key, input_dim, hid_dim1, hid_dim2, out_dim=OUT_DIM):
    """Deterministic init mimicking nn.Linear's U(-1/sqrt(fan_in), ...).

    Layers 1/2 are stored pre-transposed (in, out); the final layer is stored
    as (OUT_PAD, hid_dim2) / (OUT_PAD, 1), zero-padded from 7 to 8 rows so the
    kernel can emit a lane-dense transposed output.
    """
    ks = jax.random.split(key, 6)

    def uniform(k, shape, fan_in):
        bound = 1.0 / jnp.sqrt(fan_in)
        return jax.random.uniform(k, shape, jnp.float32, -bound, bound)

    w1 = uniform(ks[0], (input_dim, hid_dim1), input_dim)
    b1 = uniform(ks[1], (1, hid_dim1), input_dim)
    w2 = uniform(ks[2], (hid_dim1, hid_dim2), hid_dim1)
    b2 = uniform(ks[3], (1, hid_dim2), hid_dim1)
    w3 = uniform(ks[4], (hid_dim2, out_dim), hid_dim2)
    b3 = uniform(ks[5], (1, out_dim), hid_dim2)
    pad = OUT_PAD - out_dim
    w3t = jnp.pad(w3, ((0, 0), (0, pad))).T          # (OUT_PAD, hid_dim2)
    b3t = jnp.pad(b3, ((0, 0), (0, pad))).T          # (OUT_PAD, 1)
    return (w1, b1, w2, b2, w3t, b3t)


def _reference(x, params):
    w1, b1, w2, b2, w3t, b3t = params
    w3 = w3t.T[:, :OUT_DIM]
    b3 = b3t.T[:, :OUT_DIM]
    return ((x.astype(jnp.float32) @ w1 + b1) @ w2 + b2) @ w3 + b3


if __name__ == "__main__":
    key = jax.random.PRNGKey(0)
    k_x1, k_x2, k_p = jax.random.split(key, 3)

    input_dim, hid_dim1, hid_dim2 = 32, 64, 32
    params = init_params(k_p, input_dim, hid_dim1, hid_dim2)

    # Small batch: single block, exact f32 path.
    batch = 8
    x = jax.random.normal(k_x1, (batch, input_dim), jnp.float32)
    out = basic_model_forward(x, params)
    jax.block_until_ready(out)
    ref = _reference(x, params)
    assert out.shape == (batch, OUT_DIM)
    assert jnp.allclose(out, ref, atol=1e-4, rtol=1e-4)

    # Larger, non-dividing batch: exercises the cdiv grid (tb=128, 5 steps,
    # partial boundary block) and the lane-dense transposed output.
    batch2 = 600
    x2 = jax.random.normal(k_x2, (batch2, input_dim), jnp.float32)
    out2 = basic_model_forward(x2, params)
    jax.block_until_ready(out2)
    ref2 = _reference(x2, params)
    assert out2.shape == (batch2, OUT_DIM)
    assert jnp.allclose(out2, ref2, atol=1e-4, rtol=1e-4)

    # Opt-in folded single-matmul path (re-associated numerics, looser tol).
    out3 = basic_model_forward(x2, params, fold_layers=True)
    jax.block_until_ready(out3)
    assert out3.shape == (batch2, OUT_DIM)
    assert jnp.allclose(out3, ref2, atol=2e-3, rtol=2e-3)

    print("KERNEL_OK")
</pallas_src>

<mosaic_0001>
module attributes {stable_mosaic.version = 11 : i64} {
  func.func @mlp_kernel(%arg0: i32, %arg1: memref<8x32xf32, #tpu.memory_space<vmem>>, %arg2: memref<32x64xf32, #tpu.memory_space<vmem>>, %arg3: memref<1x64xf32, #tpu.memory_space<vmem>>, %arg4: memref<64x32xf32, #tpu.memory_space<vmem>>, %arg5: memref<1x32xf32, #tpu.memory_space<vmem>>, %arg6: memref<8x32xf32, #tpu.memory_space<vmem>>, %arg7: memref<8x1xf32, #tpu.memory_space<vmem>>, %arg8: memref<8x8xf32, #tpu.memory_space<vmem>>) attributes {dimension_semantics = [#tpu.dimension_semantics<parallel>], iteration_bounds = array<i64: 1>, scalar_prefetch = 0 : i64, scratch_operands = 0 : i64, tpu.core_type = #tpu.core_type<tc>, window_params = [{transform_indices = @transform_0, window_bounds = array<i64: 8, 32>}, {pipeline_mode = #tpu.pipeline_mode<synchronous>, transform_indices = @transform_1, window_bounds = array<i64: 32, 64>}, {pipeline_mode = #tpu.pipeline_mode<synchronous>, transform_indices = @transform_2, window_bounds = array<i64: 1, 64>}, {pipeline_mode = #tpu.pipeline_mode<synchronous>, transform_indices = @transform_3, window_bounds = array<i64: 64, 32>}, {pipeline_mode = #tpu.pipeline_mode<synchronous>, transform_indices = @transform_4, window_bounds = array<i64: 1, 32>}, {pipeline_mode = #tpu.pipeline_mode<synchronous>, transform_indices = @transform_5, window_bounds = array<i64: 8, 32>}, {pipeline_mode = #tpu.pipeline_mode<synchronous>, transform_indices = @transform_6, window_bounds = array<i64: 8, 1>}, {transform_indices = @transform_7, window_bounds = array<i64: 8, 8>}]} {
    %c0 = arith.constant 0 : index
    %c0_0 = arith.constant 0 : index
    %0 = vector.load %arg1[%c0, %c0_0] : memref<8x32xf32, #tpu.memory_space<vmem>>, vector<8x32xf32>
    %c0_1 = arith.constant 0 : index
    %c0_2 = arith.constant 0 : index
    %1 = vector.load %arg2[%c0_1, %c0_2] : memref<32x64xf32, #tpu.memory_space<vmem>>, vector<32x64xf32>
    %cst = arith.constant dense<0.000000e+00> : vector<8x64xf32>
    %2 = tpu.matmul %0, %1, %cst {dimension_numbers = #tpu.dot_dimension_numbers<[1], [0], [0], [1], [0, 0, 1, 1], [], []>} : vector<8x32xf32>, vector<32x64xf32>, vector<8x64xf32> -> vector<8x64xf32>
    %c0_3 = arith.constant 0 : index
    %c0_4 = arith.constant 0 : index
    %3 = vector.load %arg3[%c0_3, %c0_4] : memref<1x64xf32, #tpu.memory_space<vmem>>, vector<1x64xf32>
    %4 = vector.broadcast %3 : vector<1x64xf32> to vector<8x64xf32>
    %5 = arith.addf %2, %4 : vector<8x64xf32>
    %c0_5 = arith.constant 0 : index
    %c0_6 = arith.constant 0 : index
    %6 = vector.load %arg4[%c0_5, %c0_6] : memref<64x32xf32, #tpu.memory_space<vmem>>, vector<64x32xf32>
    %cst_7 = arith.constant dense<0.000000e+00> : vector<8x32xf32>
    %7 = tpu.matmul %5, %6, %cst_7 {dimension_numbers = #tpu.dot_dimension_numbers<[1], [0], [0], [1], [0, 0, 1, 1], [], []>} : vector<8x64xf32>, vector<64x32xf32>, vector<8x32xf32> -> vector<8x32xf32>
    %c0_8 = arith.constant 0 : index
    %c0_9 = arith.constant 0 : index
    %8 = vector.load %arg5[%c0_8, %c0_9] : memref<1x32xf32, #tpu.memory_space<vmem>>, vector<1x32xf32>
    %9 = vector.broadcast %8 : vector<1x32xf32> to vector<8x32xf32>
    %10 = arith.addf %7, %9 : vector<8x32xf32>
    %c0_10 = arith.constant 0 : index
    %c0_11 = arith.constant 0 : index
    %11 = vector.load %arg6[%c0_10, %c0_11] : memref<8x32xf32, #tpu.memory_space<vmem>>, vector<8x32xf32>
    %cst_12 = arith.constant dense<0.000000e+00> : vector<8x8xf32>
    %12 = tpu.matmul %11, %10, %cst_12 {dimension_numbers = #tpu.dot_dimension_numbers<[1], [1], [0], [0], [0, 0, 1, 0], [], []>} : vector<8x32xf32>, vector<8x32xf32>, vector<8x8xf32> -> vector<8x8xf32>
    %c0_13 = arith.constant 0 : index
    %c0_14 = arith.constant 0 : index
    %13 = vector.load %arg7[%c0_13, %c0_14] : memref<8x1xf32, #tpu.memory_space<vmem>>, vector<8x1xf32>
    %14 = vector.broadcast %13 : vector<8x1xf32> to vector<8x8xf32>
    %15 = arith.addf %12, %14 : vector<8x8xf32>
    %c0_15 = arith.constant 0 : index
    %c0_16 = arith.constant 0 : index
    %16 = vector.load %arg8[%c0_15, %c0_16] : memref<8x8xf32, #tpu.memory_space<vmem>>, vector<8x8xf32>
    tpu.vector_store %arg8[%c0_15, %c0_16], %15 {strides = array<i32>} : memref<8x8xf32, #tpu.memory_space<vmem>>, vector<8x8xf32>,
    return
  }
  func.func @transform_0(%arg0: i32) -> (i32, i32) {
    %c0_i32 = arith.constant 0 : i32
    %c0_i32_0 = arith.constant 0 : i32
    return %arg0, %c0_i32 : i32, i32
  }
  func.func @transform_1(%arg0: i32) -> (i32, i32) {
    %c0_i32 = arith.constant 0 : i32
    %c0_i32_0 = arith.constant 0 : i32
    %c0_i32_1 = arith.constant 0 : i32
    return %c0_i32, %c0_i32_0 : i32, i32
  }
  func.func @transform_2(%arg0: i32) -> (i32, i32) {
    %c0_i32 = arith.constant 0 : i32
    %c0_i32_0 = arith.constant 0 : i32
    %c0_i32_1 = arith.constant 0 : i32
    return %c0_i32, %c0_i32_0 : i32, i32
  }
  func.func @transform_3(%arg0: i32) -> (i32, i32) {
    %c0_i32 = arith.constant 0 : i32
    %c0_i32_0 = arith.constant 0 : i32
    %c0_i32_1 = arith.constant 0 : i32
    return %c0_i32, %c0_i32_0 : i32, i32
  }
  func.func @transform_4(%arg0: i32) -> (i32, i32) {
    %c0_i32 = arith.constant 0 : i32
    %c0_i32_0 = arith.constant 0 : i32
    %c0_i32_1 = arith.constant 0 : i32
    return %c0_i32, %c0_i32_0 : i32, i32
  }
  func.func @transform_5(%arg0: i32) -> (i32, i32) {
    %c0_i32 = arith.constant 0 : i32
    %c0_i32_0 = arith.constant 0 : i32
    %c0_i32_1 = arith.constant 0 : i32
    return %c0_i32, %c0_i32_0 : i32, i32
  }
  func.func @transform_6(%arg0: i32) -> (i32, i32) {
    %c0_i32 = arith.constant 0 : i32
    %c0_i32_0 = arith.constant 0 : i32
    %c0_i32_1 = arith.constant 0 : i32
    return %c0_i32, %c0_i32_0 : i32, i32
  }
  func.func @transform_7(%arg0: i32) -> (i32, i32) {
    %c0_i32 = arith.constant 0 : i32
    %c0_i32_0 = arith.constant 0 : i32
    return %c0_i32, %arg0 : i32, i32
  }
}

</mosaic_0001>

<bundles_post_ra>
// kernel: tpu_custom_call.1
= control target key start
LH: loop header
LB: loop body
LE: loop exit
PB: predicated region body
PF: predicated region fallthrough
CT: control target
= control target key end

     0   :  { %v406_v3 = vmov 0.0|0.0   ;;  %vm407_vm0 = vmmov 0   ;;  %v408_v6 = vmov 0.0   ;;  %s520_s0 = inlined_call_operand.vmem [shape: f32[8,32], index: 0, kind: input, shape index: {}]   ;;  %s521_s1 = inlined_call_operand.vmem [shape: f32[32,64], index: 1, kind: input, shape index: {}]   ;;  %s522_s2 = inlined_call_operand.vmem [shape: f32[1,64], index: 2, kind: input, shape index: {}]   ;;  %s523_s3 = inlined_call_operand.vmem [shape: f32[64,32], index: 3, kind: input, shape index: {}]   ;;  %s524_s4 = inlined_call_operand.vmem [shape: f32[1,32], index: 4, kind: input, shape index: {}]   ;;  %s525_s5 = inlined_call_operand.vmem [shape: f32[8,32], index: 5, kind: input, shape index: {}]   ;;  %s526_s6 = inlined_call_operand.vmem [shape: f32[8,1], index: 6, kind: input, shape index: {}]   ;;  %s527_s7 = inlined_call_operand.hbm [shape: f32[8,8], index: 7, kind: output, shape index: {}]  }
   0x1   :  { %v28_v0 = vld [vmem:[%s521_s1] sm:$0xff]  ;;  %v29_v1 = vld [vmem:[%s521_s1 + $0x8] sm:$0xff]  ;;  %v30_v2 = vld [vmem:[%s521_s1 + $0x10] sm:$0xff]  ;;  %358 = vmatprep.subr.bf16.mxu0 %v406_v3  ;;  %331 = vmatprep.mubr.msk.f32.mxu0 %vm407_vm0, %v408_v6 }
   0x2   :  { %v359_v4 = vpack.c.bf16 %v29_v1, %v28_v0  ;;  %v31_v5 = vld [vmem:[%s521_s1 + $0x18] sm:$0xff]  ;;  %v113_v7 = vld [vmem:[%s523_s3] sm:$0xff]  ;;  %364 = vmatprep.subr.bf16.mxu1 %v406_v3  ;;  %v114_v8 = vld [vmem:[%s523_s3 + $0x8] sm:$0xff]  ;;  %350 = vmatprep.mubr.msk.f32.mxu1 %vm407_vm0, %v408_v6 }
   0x3   :  { %v115_v9 = vld [vmem:[%s523_s3 + $0x10] sm:$0xff]  ;;  %v116_v10 = vld [vmem:[%s523_s3 + $0x18] sm:$0xff]  ;;  %v362_v11 = vpack.c.bf16 %v31_v5, %v30_v2  ;;  %v365_v12 = vpack.c.bf16 %v114_v8, %v113_v7 }
   0x4   :  { %360 = vmatpush3.bf16.msra.mxu0 %v359_v4 }
   0x5   :  { %361 = vmatprep.subr.bf16.mxu0 %v406_v3 }
   0x6   :  { %12 = vsyncpa [#allocation3], 0  ;;  %366 = vmatpush3.bf16.msra.mxu1 %v365_v12  ;;  %v368_v13 = vpack.c.bf16 %v116_v10, %v115_v9  ;;  %v117_v14 = vld [vmem:[%s523_s3 + $0x20] sm:$0xff]  ;;  %v118_v15 = vld [vmem:[%s523_s3 + $0x28] sm:$0xff]  ;;  %vm39_vm1 = vcmask 261120   ;;  %vm128_vm2 = vcmask 523264  }
   0x7   :  { %367 = vmatprep.subr.bf16.mxu1 %v406_v3  ;;  %v27_v16 = vld [vmem:[%s520_s0] sm:$0xff]  ;;  %v371_v17 = vpack.c.bf16 %v118_v15, %v117_v14  ;;  %v119_v18 = vld [vmem:[%s523_s3 + $0x30] sm:$0xff]  ;;  %v120_v19 = vld [vmem:[%s523_s3 + $0x38] sm:$0xff]  ;;  %v409_v26 = vmov 0   ;;  %vm285_vm3 = vcmask 64512  }
   0x8   :  { %363 = vmatpush3.bf16.msra.mxu0 %v362_v11  ;;  %v374_v20 = vpack.c.bf16 %v120_v19, %v119_v18  ;;  %v301_v21 = vld [vmem:[%s522_s2] ss:$0 sm:$0xff]  ;;  %381 = vset.pattern.permute.xlu0 %v409_v26 }
   0x9   :  { %353 = vmatprep.subr.mxu0 %v408_v6  ;;  %v203_v25 = vld [vmem:[%s526_s6] sm:$0xff]  ;;  %s410_s6 = smov [#allocation2]  }
   0xa   :  { %369 = vmatpush3.bf16.msra.mxu1 %v368_v13  ;;  %206 = vperm.xlu0 %381, %v203_v25   ;;  %v303_v27 = vld [vmem:[%s524_s4] ss:$0 sm:$0xff]  ;;  %s293_s8 = sshll.u32 %s410_s6, 4  ;;  %s294_s8 = int_to_ptr.vmem [resolvable:$true] %s293_s8 }
   0xb   :  { %332 = vmatmul.mubr.msk.f32.vlgmr.msra.gmra.mrb[0].mxu0 %vm39_vm1, %v27_v16  ;;  %370 = vmatprep.subr.bf16.mxu1 %v406_v3  ;;  %v202_v31 = vld [vmem:[%s525_s5] sm:$0xff]  ;;  %s382_s4 = scalar_lea.vmem %s294_s8, 128  ;;  %p387_p1 = scmp.lt.s32.totalorder %s294_s8, %s294_s8 }
   0xc   :  { %355 = vmatprep.mubr.msk.f32.mxu0 %vm407_vm0, %v408_v6  ;;  %p383_p0 = scmp.ne.s32.totalorder %s294_s8, %s382_s4  ;;  %p388_p2 = scmp.lt.s32.totalorder %s382_s4, %s382_s4 }
   0xe   :  { %372 = vmatpush3.bf16.msra.mxu1 %v371_v17  ;;  %p389_p3 = por %p388_p2, %p387_p1 }
   0xf   :  { %373 = vmatprep.subr.bf16.mxu1 %v406_v3 }
  0x10   :  { %p390_p4 = pnand %p389_p3, %p383_p0 }
  0x12   :  { %375 = vmatpush3.bf16.msra.mxu1 %v374_v20 }
  0x89   :  { %v207_v32 = vpop.permute.xlu0 %206 }
  0xde   :  { %v109_v22 = vpop.f32.mrb[0].mxu0 }
  0xdf   :  { %v110_v23 = vadd.f32 %v301_v21, %v109_v22  ;;  %v333_v24 = vpop.f32.mrb[1].mxu0 }
  0xe1   :  { %351 = vmatmul.mubr.msk.f32.vlgmr.msra.gmra.mrb[0].mxu1 %vm128_vm2, %v110_v23 }
 0x1b4   :  { %v198_v28 = vpop.f32.mrb[0].mxu1 }
 0x1b5   :  { %v199_v29 = vadd.f32 %v303_v27, %v198_v28  ;;  %v352_v30 = vpop.f32.mrb[1].mxu1 }
 0x1b7   :  { %354 = vmatpush3.xpose.msk.msra.mxu0 %vm39_vm1, %v199_v29 }
 0x1ba   :  { %356 = vmatmul.mubr.msk.f32.vlgmr.msra.gmra.mrb[2].mxu0 %vm39_vm1, %v202_v31 }
 0x28d   :  { %v281_v33 = vpop.f32.mrb[2].mxu0 }
 0x28e   :  { %v282_v34 = vadd.f32 %v281_v33, %v207_v32  ;;  %v357_v35 = vpop.f32.mrb[3].mxu0 }
 0x290   :  { %286 = vst.msk [vmem:[#allocation2] sm:$0xff] %vm285_vm3, %v282_v34 }
 0x291   :  { %393 = shalt.err (!%p390_p4)
}
 0x292   :  { %s394_s10 = scalar_lea.hbm %s527_s7, 128 }
 0x293   :  { %p395_p5 = scmp.ne.s32.totalorder %s527_s7, %s394_s10  ;;  %p398_p6 = scmp.lt.u32.totalorder %s394_s10, %s527_s7 }
 0x295   :  { %p400_p7 = pnand %p398_p6, %p395_p5 }
 0x297   :  { %403 = shalt.err (!%p400_p7)
}
 0x298   :  { %296 = dma.vmem_to_hbm [thread:$0]  %s294_s8, 128, %s527_s7, [#allocation3]  }
 0x299   :  { %404 = dma.done.wait [#allocation3], 128  }
 0x29a   :  { %405 = vsyncadd [#allocation3], 4294967168 }
 0x29b   :  { %300 = vsyncpa [#allocation3], 1 }

</bundles_post_ra>
